<compile_context>
chip_gen: v7x
topology: tpu7x:2x2x1
jax: 0.10.0
libtpu: 0.0.40
codegen_flags: <defaults>
</compile_context>

<pallas_src>
import functools
import math

import jax
import jax.numpy as jnp
from jax.experimental import pallas as pl
from jax.experimental.pallas import tpu as pltpu


def _round_up(x, n):
    return ((x + n - 1) // n) * n


def _aam_kernel(cos_ref, label_ref, phis_ref, loss_ref, corr_ref,
                m_scr, l_scr, a_scr, *, s, num_classes, mask_tail):
    k = pl.program_id(1)
    num_k = pl.num_programs(1)

    @pl.when(k == 0)
    def _init():
        m_scr[...] = jnp.full_like(m_scr, -jnp.inf)
        l_scr[...] = jnp.zeros_like(l_scr)
        a_scr[...] = jnp.full_like(a_scr, num_classes)

    cos = cos_ref[...].astype(jnp.float32)           # (tb, tc) upcast in VMEM
    tb, tc = cos.shape
    label = label_ref[...]                           # (tb, 1) int32
    phi_s = phis_ref[...]                            # (tb, 1) f32 == phi * s

    # Tile-local lane iota (loop-invariant); only (tb,1)/scalar work varies with k.
    col_local = jax.lax.broadcasted_iota(jnp.int32, (tb, tc), 1)
    lbl_local = label - k * tc                       # (tb, 1)
    is_lbl = col_local == lbl_local

    out = jnp.where(is_lbl, phi_s, cos * s)          # scaled logits tile
    if mask_tail:
        # The class tail of the unpadded (cdiv-gridded) input holds unspecified
        # data: keep it behind -inf.  Only matters on the last k tile, but the
        # select is kept unconditional for lowering robustness (it is filler
        # under the HBM roofline on v5e/v6e).
        out = jnp.where(col_local < (num_classes - k * tc), out, -jnp.inf)

    # Online logsumexp + first-index argmax (class tiles arrive in order).
    tile_max = jnp.max(out, axis=1, keepdims=True)
    run_max = m_scr[...]
    new_max = jnp.maximum(run_max, tile_max)
    l_scr[...] = (l_scr[...] * jnp.exp(run_max - new_max)
                  + jnp.sum(jnp.exp(out - new_max), axis=1, keepdims=True))
    tile_arg = jnp.min(jnp.where(out == tile_max, col_local, tc),
                       axis=1, keepdims=True) + k * tc
    a_scr[...] = jnp.where(tile_max > run_max, tile_arg, a_scr[...])
    m_scr[...] = new_max

    @pl.when(k == num_k - 1)
    def _finalize():
        loss_ref[...] = m_scr[...] + jnp.log(l_scr[...]) - phi_s
        corr_ref[...] = (a_scr[...] == label).astype(jnp.float32)


def aamsoftmax_forward(cosine, label, mask=None, *, m=0.2, s=30.0,
                       supervised=True, tb=None, tc=None, cast_to_bf16=False):
    """Returns (loss, prec1) with the same semantics as AAMsoftmax.forward."""
    B, C = cosine.shape
    label_i = label.astype(jnp.int32)

    # ---- hoisted label-column ArcFace math (B elements, wrapper side) ------
    cos_m, sin_m = math.cos(m), math.sin(m)
    th, mm = math.cos(math.pi - m), math.sin(math.pi - m) * m
    cos_lbl = jnp.take_along_axis(cosine, label_i[:, None], axis=1).astype(jnp.float32)
    sin_lbl = jnp.sqrt(jnp.clip(1.0 - cos_lbl * cos_lbl, 0.0, 1.0))
    phi = cos_lbl * cos_m - sin_lbl * sin_m
    phi = jnp.where(cos_lbl - th > 0, phi, cos_lbl - mm)
    phi_s = (phi * s).astype(jnp.float32)            # (B, 1) target logit

    if cast_to_bf16 and cosine.dtype == jnp.float32:
        # opt-in: halves HBM reads on memory-bound chips (v5e); numerics change.
        cosine = cosine.astype(jnp.bfloat16)
    itemsize = jnp.dtype(cosine.dtype).itemsize

    # ---- tile sizes ---------------------------------------------------------
    if tb is None:
        tb = min(_round_up(B, 8), 256)
        # Megacore (v7x): prefer >=2 batch blocks so the "parallel" axis can be
        # split across both TensorCores; harmless at these sizes on 1-TC chips.
        if B >= 16 and pl.cdiv(B, tb) < 2:
            tb = max(8, _round_up((B + 1) // 2, 8))
    if tc is None:
        # Multi-MiB per-step class tiles amortize the ~0.35us grid-step cost.
        cap = 4096 if itemsize <= 2 else 2048
        tc = min(_round_up(C, 128), cap)
    assert tb % 8 == 0 and tc % 128 == 0

    label_col = label_i.reshape(B, 1)
    mask_tail = (C % tc) != 0

    kernel = functools.partial(_aam_kernel, s=float(s), num_classes=C,
                               mask_tail=mask_tail)

    # VMEM budget from the f32 in-kernel intermediates (out / exp / iota / masks),
    # plus a double-buffered native-dtype input tile; capped v7x-safe (<= 48 MiB).
    in_tile = tb * tc * itemsize
    f32_tile = tb * tc * 4
    vmem_limit = int(min(48 * 1024 * 1024,
                         max(16 * 1024 * 1024,
                             2 * in_tile + 6 * f32_tile + (1 << 20))))

    loss_col, corr_col = pl.pallas_call(
        kernel,
        out_shape=(jax.ShapeDtypeStruct((B, 1), jnp.float32),
                   jax.ShapeDtypeStruct((B, 1), jnp.float32)),
        grid_spec=pltpu.PrefetchScalarGridSpec(
            num_scalar_prefetch=0,
            grid=(pl.cdiv(B, tb), pl.cdiv(C, tc)),
            in_specs=[pl.BlockSpec((tb, tc), lambda i, k: (i, k)),
                      pl.BlockSpec((tb, 1), lambda i, k: (i, 0)),
                      pl.BlockSpec((tb, 1), lambda i, k: (i, 0))],
            out_specs=(pl.BlockSpec((tb, 1), lambda i, k: (i, 0)),
                       pl.BlockSpec((tb, 1), lambda i, k: (i, 0))),
            scratch_shapes=[pltpu.VMEM((tb, 1), jnp.float32),   # running max
                            pltpu.VMEM((tb, 1), jnp.float32),   # running sum-exp
                            pltpu.VMEM((tb, 1), jnp.int32)]),   # running argmax
        compiler_params=pltpu.CompilerParams(
            dimension_semantics=("parallel", "arbitrary"),
            vmem_limit_bytes=vmem_limit),
    )(cosine, label_col, phi_s)

    loss_row = loss_col[:, 0]
    correct = corr_col[:, 0]
    if supervised:
        loss = jnp.mean(loss_row)
    else:
        loss = jnp.mean(loss_row * mask.astype(jnp.float32))
    prec1 = jnp.mean(correct) * 100.0
    return loss, prec1


def _reference(cosine, label, mask, *, m, s, supervised):
    cos_m, sin_m = math.cos(m), math.sin(m)
    th, mm = math.cos(math.pi - m), math.sin(math.pi - m) * m
    sine = jnp.sqrt(jnp.clip(1.0 - cosine * cosine, 0.0, 1.0))
    phi = cosine * cos_m - sine * sin_m
    phi = jnp.where(cosine - th > 0, phi, cosine - mm)
    one_hot = jax.nn.one_hot(label, cosine.shape[1], dtype=cosine.dtype)
    output = (one_hot * phi + (1.0 - one_hot) * cosine) * s
    logp = jax.nn.log_softmax(output, axis=1)
    loss_row = -jnp.take_along_axis(logp, label[:, None], axis=1)[:, 0]
    loss = jnp.mean(loss_row) if supervised else jnp.mean(loss_row * mask)
    prec1 = jnp.mean((jnp.argmax(output, axis=1) == label).astype(jnp.float32)) * 100.0
    return loss, prec1


if __name__ == "__main__":
    key = jax.random.PRNGKey(0)
    B, C = 16, 512                     # batch, num speaker classes
    m_param, s_param = 0.2, 30.0       # AAMsoftmax(m=0.2, s=30)

    k1, k2, k3 = jax.random.split(key, 3)
    cosine = jnp.tanh(jax.random.normal(k1, (B, C), dtype=jnp.float32))  # in [-1, 1]
    label = jax.random.randint(k2, (B,), 0, C, dtype=jnp.int32)
    mask = (jax.random.uniform(k3, (B,)) > 0.5).astype(jnp.float32)

    # Default tiles (single class tile, 2 batch blocks for megacore).
    loss_d, prec_d = aamsoftmax_forward(cosine, label, mask, m=m_param,
                                        s=s_param, supervised=True)
    jax.block_until_ready((loss_d, prec_d))
    ref_loss, ref_prec = _reference(cosine, label, mask, m=m_param,
                                    s=s_param, supervised=True)
    assert jnp.allclose(loss_d, ref_loss, atol=1e-4, rtol=1e-4)
    assert jnp.allclose(prec_d, ref_prec, atol=1e-4)

    # Small explicit tiles so the multi-tile online-logsumexp path is exercised.
    loss_s, prec_s = aamsoftmax_forward(cosine, label, mask, m=m_param,
                                        s=s_param, supervised=True, tb=8, tc=128)
    jax.block_until_ready((loss_s, prec_s))
    assert jnp.allclose(loss_s, ref_loss, atol=1e-4, rtol=1e-4)
    assert jnp.allclose(prec_s, ref_prec, atol=1e-4)

    # Unsupervised (masked) branch.
    loss_u, prec_u = aamsoftmax_forward(cosine, label, mask, m=m_param,
                                        s=s_param, supervised=False, tb=8, tc=128)
    jax.block_until_ready((loss_u, prec_u))
    ref_loss_u, _ = _reference(cosine, label, mask, m=m_param,
                               s=s_param, supervised=False)
    assert jnp.allclose(loss_u, ref_loss_u, atol=1e-4, rtol=1e-4)

    # Ragged shapes (partial edge blocks in both axes, no padding) + native bf16.
    B2, C2 = 12, 300
    k4, k5 = jax.random.split(k3)
    cos2 = jnp.tanh(jax.random.normal(k4, (B2, C2), dtype=jnp.float32)).astype(jnp.bfloat16)
    lab2 = jax.random.randint(k5, (B2,), 0, C2, dtype=jnp.int32)
    loss2, prec2 = aamsoftmax_forward(cos2, lab2, None, m=m_param,
                                      s=s_param, supervised=True, tb=16, tc=128)
    jax.block_until_ready((loss2, prec2))
    ref_loss2, ref_prec2 = _reference(cos2.astype(jnp.float32), lab2,
                                      jnp.ones((B2,), jnp.float32),
                                      m=m_param, s=s_param, supervised=True)
    assert jnp.allclose(loss2, ref_loss2, atol=2e-3, rtol=2e-3)
    assert jnp.allclose(prec2, ref_prec2, atol=1e-3)

    print("KERNEL_OK")
</pallas_src>

<mosaic_0001>
module attributes {stable_mosaic.version = 11 : i64} {
  func.func @_aam_kernel(%arg0: i32, %arg1: i32, %arg2: memref<8x512xf32, #tpu.memory_space<vmem>>, %arg3: memref<8x1xi32, #tpu.memory_space<vmem>>, %arg4: memref<8x1xf32, #tpu.memory_space<vmem>>, %arg5: memref<8x1xf32, #tpu.memory_space<vmem>>, %arg6: memref<8x1xf32, #tpu.memory_space<vmem>>, %arg7: memref<8x1xf32, #tpu.memory_space<vmem>>, %arg8: memref<8x1xf32, #tpu.memory_space<vmem>>, %arg9: memref<8x1xi32, #tpu.memory_space<vmem>>) attributes {dimension_semantics = [#tpu.dimension_semantics<parallel>, #tpu.dimension_semantics<arbitrary>], iteration_bounds = array<i64: 2, 1>, scalar_prefetch = 0 : i64, scratch_operands = 3 : i64, tpu.core_type = #tpu.core_type<tc>, window_params = [{transform_indices = @transform_0, window_bounds = array<i64: 8, 512>}, {transform_indices = @transform_1, window_bounds = array<i64: 8, 1>}, {transform_indices = @transform_2, window_bounds = array<i64: 8, 1>}, {transform_indices = @transform_3, window_bounds = array<i64: 8, 1>}, {transform_indices = @transform_4, window_bounds = array<i64: 8, 1>}]} {
    %c0_i32 = arith.constant 0 : i32
    %0 = arith.cmpi eq, %arg1, %c0_i32 : i32
    %1 = arith.extui %0 : i1 to i32
    %c0_i32_0 = arith.constant 0 : i32
    %2 = arith.cmpi ne, %1, %c0_i32_0 : i32
    scf.if %2 {
      %cst_25 = arith.constant 0xFF800000 : f32
      %49 = vector.broadcast %cst_25 : f32 to vector<8x1xf32>
      %c0_26 = arith.constant 0 : index
      %c0_27 = arith.constant 0 : index
      %50 = vector.load %arg7[%c0_26, %c0_27] : memref<8x1xf32, #tpu.memory_space<vmem>>, vector<8x1xf32>
      tpu.vector_store %arg7[%c0_26, %c0_27], %49 {strides = array<i32>} : memref<8x1xf32, #tpu.memory_space<vmem>>, vector<8x1xf32>,
      %cst_28 = arith.constant 0.000000e+00 : f32
      %51 = vector.broadcast %cst_28 : f32 to vector<8x1xf32>
      %c0_29 = arith.constant 0 : index
      %c0_30 = arith.constant 0 : index
      %52 = vector.load %arg8[%c0_29, %c0_30] : memref<8x1xf32, #tpu.memory_space<vmem>>, vector<8x1xf32>
      tpu.vector_store %arg8[%c0_29, %c0_30], %51 {strides = array<i32>} : memref<8x1xf32, #tpu.memory_space<vmem>>, vector<8x1xf32>,
      %c512_i32_31 = arith.constant 512 : i32
      %53 = vector.broadcast %c512_i32_31 : i32 to vector<8x1xi32>
      %c0_32 = arith.constant 0 : index
      %c0_33 = arith.constant 0 : index
      %54 = vector.load %arg9[%c0_32, %c0_33] : memref<8x1xi32, #tpu.memory_space<vmem>>, vector<8x1xi32>
      tpu.vector_store %arg9[%c0_32, %c0_33], %53 {strides = array<i32>} : memref<8x1xi32, #tpu.memory_space<vmem>>, vector<8x1xi32>,
    } else {
    }
    %c0 = arith.constant 0 : index
    %c0_1 = arith.constant 0 : index
    %3 = vector.load %arg2[%c0, %c0_1] : memref<8x512xf32, #tpu.memory_space<vmem>>, vector<8x512xf32>
    %c0_2 = arith.constant 0 : index
    %c0_3 = arith.constant 0 : index
    %4 = vector.load %arg3[%c0_2, %c0_3] : memref<8x1xi32, #tpu.memory_space<vmem>>, vector<8x1xi32>
    %c0_4 = arith.constant 0 : index
    %c0_5 = arith.constant 0 : index
    %5 = vector.load %arg4[%c0_4, %c0_5] : memref<8x1xf32, #tpu.memory_space<vmem>>, vector<8x1xf32>
    %6 = tpu.iota {dimensions = array<i32: 1>} : vector<8x512xi32>
    %c512_i32 = arith.constant 512 : i32
    %7 = arith.muli %arg1, %c512_i32 : i32
    %8 = vector.broadcast %7 : i32 to vector<8x1xi32>
    %9 = arith.subi %4, %8 : vector<8x1xi32>
    %10 = vector.broadcast %9 : vector<8x1xi32> to vector<8x512xi32>
    %11 = arith.cmpi eq, %6, %10 : vector<8x512xi32>
    %cst = arith.constant 3.000000e+01 : f32
    %12 = vector.broadcast %cst : f32 to vector<8x512xf32>
    %13 = arith.mulf %3, %12 : vector<8x512xf32>
    %14 = vector.shape_cast %5 : vector<8x1xf32> to vector<8x1xf32>
    %15 = vector.broadcast %14 : vector<8x1xf32> to vector<8x512xf32>
    %16 = arith.select %11, %15, %13 : vector<8x512xi1>, vector<8x512xf32>
    %cst_6 = arith.constant dense<0xFF800000> : vector<8xf32>
    %17 = vector.multi_reduction <maximumf>, %16, %cst_6 [1] : vector<8x512xf32> to vector<8xf32>
    %18 = vector.shape_cast %17 : vector<8xf32> to vector<8x1xf32>
    %c0_7 = arith.constant 0 : index
    %c0_8 = arith.constant 0 : index
    %19 = vector.load %arg7[%c0_7, %c0_8] : memref<8x1xf32, #tpu.memory_space<vmem>>, vector<8x1xf32>
    %20 = arith.maximumf %19, %18 : vector<8x1xf32>
    %c0_9 = arith.constant 0 : index
    %c0_10 = arith.constant 0 : index
    %21 = vector.load %arg8[%c0_9, %c0_10] : memref<8x1xf32, #tpu.memory_space<vmem>>, vector<8x1xf32>
    %22 = arith.subf %19, %20 : vector<8x1xf32>
    %23 = math.exp %22 : vector<8x1xf32>
    %24 = arith.mulf %21, %23 : vector<8x1xf32>
    %25 = vector.broadcast %20 : vector<8x1xf32> to vector<8x512xf32>
    %26 = arith.subf %16, %25 : vector<8x512xf32>
    %27 = math.exp %26 : vector<8x512xf32>
    %cst_11 = arith.constant dense<0.000000e+00> : vector<8xf32>
    %28 = vector.multi_reduction <add>, %27, %cst_11 [1] : vector<8x512xf32> to vector<8xf32>
    %29 = vector.shape_cast %28 : vector<8xf32> to vector<8x1xf32>
    %30 = arith.addf %24, %29 : vector<8x1xf32>
    %c0_12 = arith.constant 0 : index
    %c0_13 = arith.constant 0 : index
    %31 = vector.load %arg8[%c0_12, %c0_13] : memref<8x1xf32, #tpu.memory_space<vmem>>, vector<8x1xf32>
    tpu.vector_store %arg8[%c0_12, %c0_13], %30 {strides = array<i32>} : memref<8x1xf32, #tpu.memory_space<vmem>>, vector<8x1xf32>,
    %32 = vector.broadcast %18 : vector<8x1xf32> to vector<8x512xf32>
    %33 = arith.cmpf oeq, %16, %32 : vector<8x512xf32>
    %c512_i32_14 = arith.constant 512 : i32
    %34 = vector.broadcast %c512_i32_14 : i32 to vector<8x512xi32>
    %35 = arith.select %33, %6, %34 : vector<8x512xi1>, vector<8x512xi32>
    %cst_15 = arith.constant dense<2147483647> : vector<8xi32>
    %36 = vector.multi_reduction <minsi>, %35, %cst_15 [1] : vector<8x512xi32> to vector<8xi32>
    %37 = vector.shape_cast %36 : vector<8xi32> to vector<8x1xi32>
    %c512_i32_16 = arith.constant 512 : i32
    %38 = arith.muli %arg1, %c512_i32_16 : i32
    %39 = vector.broadcast %38 : i32 to vector<8x1xi32>
    %40 = arith.addi %37, %39 : vector<8x1xi32>
    %41 = arith.cmpf ogt, %18, %19 : vector<8x1xf32>
    %c0_17 = arith.constant 0 : index
    %c0_18 = arith.constant 0 : index
    %42 = vector.load %arg9[%c0_17, %c0_18] : memref<8x1xi32, #tpu.memory_space<vmem>>, vector<8x1xi32>
    %43 = arith.select %41, %40, %42 : vector<8x1xi1>, vector<8x1xi32>
    %c0_19 = arith.constant 0 : index
    %c0_20 = arith.constant 0 : index
    %44 = vector.load %arg9[%c0_19, %c0_20] : memref<8x1xi32, #tpu.memory_space<vmem>>, vector<8x1xi32>
    tpu.vector_store %arg9[%c0_19, %c0_20], %43 {strides = array<i32>} : memref<8x1xi32, #tpu.memory_space<vmem>>, vector<8x1xi32>,
    %c0_21 = arith.constant 0 : index
    %c0_22 = arith.constant 0 : index
    %45 = vector.load %arg7[%c0_21, %c0_22] : memref<8x1xf32, #tpu.memory_space<vmem>>, vector<8x1xf32>
    tpu.vector_store %arg7[%c0_21, %c0_22], %20 {strides = array<i32>} : memref<8x1xf32, #tpu.memory_space<vmem>>, vector<8x1xf32>,
    %c0_i32_23 = arith.constant 0 : i32
    %46 = arith.cmpi eq, %arg1, %c0_i32_23 : i32
    %47 = arith.extui %46 : i1 to i32
    %c0_i32_24 = arith.constant 0 : i32
    %48 = arith.cmpi ne, %47, %c0_i32_24 : i32
    scf.if %48 {
      %c0_25 = arith.constant 0 : index
      %c0_26 = arith.constant 0 : index
      %49 = vector.load %arg7[%c0_25, %c0_26] : memref<8x1xf32, #tpu.memory_space<vmem>>, vector<8x1xf32>
      %c0_27 = arith.constant 0 : index
      %c0_28 = arith.constant 0 : index
      %50 = vector.load %arg8[%c0_27, %c0_28] : memref<8x1xf32, #tpu.memory_space<vmem>>, vector<8x1xf32>
      %51 = math.log %50 : vector<8x1xf32>
      %52 = arith.addf %49, %51 : vector<8x1xf32>
      %53 = arith.subf %52, %5 : vector<8x1xf32>
      %c0_29 = arith.constant 0 : index
      %c0_30 = arith.constant 0 : index
      %54 = vector.load %arg5[%c0_29, %c0_30] : memref<8x1xf32, #tpu.memory_space<vmem>>, vector<8x1xf32>
      tpu.vector_store %arg5[%c0_29, %c0_30], %53 {strides = array<i32>} : memref<8x1xf32, #tpu.memory_space<vmem>>, vector<8x1xf32>,
      %c0_31 = arith.constant 0 : index
      %c0_32 = arith.constant 0 : index
      %55 = vector.load %arg9[%c0_31, %c0_32] : memref<8x1xi32, #tpu.memory_space<vmem>>, vector<8x1xi32>
      %56 = arith.cmpi eq, %55, %4 : vector<8x1xi32>
      %57 = arith.extui %56 : vector<8x1xi1> to vector<8x1xi32>
      %58 = arith.sitofp %57 : vector<8x1xi32> to vector<8x1xf32>
      %c0_33 = arith.constant 0 : index
      %c0_34 = arith.constant 0 : index
      %59 = vector.load %arg6[%c0_33, %c0_34] : memref<8x1xf32, #tpu.memory_space<vmem>>, vector<8x1xf32>
      tpu.vector_store %arg6[%c0_33, %c0_34], %58 {strides = array<i32>} : memref<8x1xf32, #tpu.memory_space<vmem>>, vector<8x1xf32>,
    } else {
    }
    return
  }
  func.func @transform_0(%arg0: i32, %arg1: i32) -> (i32, i32) {
    %c0_i32 = arith.constant 0 : i32
    return %arg0, %arg1 : i32, i32
  }
  func.func @transform_1(%arg0: i32, %arg1: i32) -> (i32, i32) {
    %c0_i32 = arith.constant 0 : i32
    %c0_i32_0 = arith.constant 0 : i32
    return %arg0, %c0_i32 : i32, i32
  }
  func.func @transform_2(%arg0: i32, %arg1: i32) -> (i32, i32) {
    %c0_i32 = arith.constant 0 : i32
    %c0_i32_0 = arith.constant 0 : i32
    return %arg0, %c0_i32 : i32, i32
  }
  func.func @transform_3(%arg0: i32, %arg1: i32) -> (i32, i32) {
    %c0_i32 = arith.constant 0 : i32
    %c0_i32_0 = arith.constant 0 : i32
    return %arg0, %c0_i32 : i32, i32
  }
  func.func @transform_4(%arg0: i32, %arg1: i32) -> (i32, i32) {
    %c0_i32 = arith.constant 0 : i32
    %c0_i32_0 = arith.constant 0 : i32
    return %arg0, %c0_i32 : i32, i32
  }
}

</mosaic_0001>

<bundles_post_ra>
// kernel: tpu_custom_call.1
= control target key start
LH: loop header
LB: loop body
LE: loop exit
PB: predicated region body
PF: predicated region fallthrough
CT: control target
= control target key end

     0   :  { %10 = vsyncpa [#allocation6], 0  ;;  %s908_s0 = inlined_call_operand.hbm [shape: f32[16,512], index: 0, kind: input, shape index: {}]   ;;  %s909_s1 = inlined_call_operand.vmem [shape: s32[16,1], index: 1, kind: input, shape index: {}]   ;;  %s910_s2 = inlined_call_operand.vmem [shape: f32[16,1], index: 2, kind: input, shape index: {}]   ;;  %s911_s3 = inlined_call_operand.vmem [shape: f32[16,1], index: 3, kind: output, shape index: {0}]   ;;  %s912_s4 = inlined_call_operand.vmem [shape: f32[16,1], index: 4, kind: output, shape index: {1}]  }
   0x1   :  { %12 = vsyncpa [#allocation6 + $0x1], 0  ;;  %s737_s15 = smov 0   ;;  %s739_s16 = smov 0  }
   0x2   :  { %s741_s17 = smov 0   ;;  %s743_s18 = smov 0  }
   0x3   :  { %s745_s19 = smov 0   ;;  %s747_s20 = smov 0  }
   0x4 LB: > { %s535_s21 = sadd.s32 4294967295, %s705_s20   ;;  %s30_s22 = sadd.s32 1, %s701_s19  ;;  %s705_s20 = sphi %s747_s20, %s18_s20   ;;  %s701_s19 = sphi %s745_s19, %s922_s19   ;;  %s697_s18 = sphi %s743_s18, %s921_s18   ;;  %s693_s17 = sphi %s741_s17, %s920_s17   ;;  %s689_s16 = sphi %s739_s16, %s919_s16   ;;  %s685_s15 = sphi %s737_s15, %s918_s15  }
   0x5   : > { %p32_p0 = scmp.ge.s32.totalorder %s30_s22, 2  ;;  %s39_s23 = sadd.s32 1, %s693_s17 }
   0x6   : > { %p46_p1 = scmp.ne.s32.totalorder %s693_s17, %s689_s16  ;;  %p47_p2 = scmp.eq.s32.totalorder %s705_s20, 0 }
   0x7   : > { %s924_s22 = smov (%p32_p0, %s30_s22), 0  ;;  %p52_p4 = scmp.ne.s32.totalorder %s689_s16, %s685_s15 }
   0x8   : > { %p773_p3 = por %p47_p2, %p46_p1  ;;  %s34_s25 = ssub.s32 %s701_s19, %s924_s22 }
   0x9   : > { %p53_p5 = scmp.eq.s32.totalorder %s535_s21, 0  ;;  %p37_p6 = scmp.eq.s32.totalorder %s34_s25, 0 }
   0xa   : > { %p558_p8 = scmp.lt.s32.totalorder %s705_s20, 2  ;;  %s180_s28 = sand.u32 1, %s693_s17  }
   0xb   : > { %p780_p7 = por %p53_p5, %p52_p4  ;;  %s551_s29 = sshll.u32 %s701_s19, 9 }
   0xc   : > { %s786_s27 = scalar_select %p37_p6, %s693_s17, %s39_s23  }
   0xd   : > { %s539_s30 = sshll.u32 %s180_s28, 5  ;;  %s793_s7 = scalar_lea.hbm %s908_s0, %s551_s29 }
   0xe   : > { %s184_s8 = scalar_lea.vmem [#allocation5], %s539_s30  ;;  %p797_p9 = pnand %p558_p8, %p773_p3 }
   0xf   : > { %s194_s9 = sshll.u32 %s184_s8, 4  ;;  %s181_s11 = scalar_lea.sflag [#allocation6], %s180_s28  ;;  %s801_s9 = int_to_ptr.vmem [resolvable:$true] %s194_s9 }
  0x10   : > { %s625_s12 = scalar_lea.hbm %s793_s7, 512  ;;  %p627_p13 = pneg %p797_p9 }
  0x11   : > { %p626_p12 = scmp.ne.s32.totalorder %s793_s7, %s625_s12  ;;  %s630_s15 = scalar_lea.hbm %s908_s0, 1024 }
  0x12   : > { %p631_p2 = scmp.lt.u32.totalorder %s793_s7, %s908_s0  ;;  %p632_p3 = scmp.lt.u32.totalorder %s630_s15, %s625_s12 }
  0x13   : > { %p628_p0 = pnand %p627_p13, %p626_p12  ;;  %p634_p5 = scmp.lt.u32.totalorder %s625_s12, %s793_s7 }
  0x14   : > { %p633_p4 = por %p632_p3, %p631_p2 }
  0x15   : > { %p629_p1 = pneg %p628_p0 }
  0x16   : > { %p635_p6 = por %p634_p5, %p633_p4 }
  0x18   : > { %p636_p8 = pnand %p635_p6, %p629_p1 }
  0x1a   : > { %639 = shalt.err (!%p636_p8)
}
  0x1b   : > { %s640_s24 = scalar_lea.vmem %s801_s9, 512  ;;  %s707_s25 = smov [#allocation5]  }
  0x1c   : > { %p641_p12 = scmp.ne.s32.totalorder %s801_s9, %s640_s24  ;;  %s645_s28 = sshll.u32 %s707_s25, 4  ;;  %s646_s28 = int_to_ptr.vmem [resolvable:$false] %s645_s28 }
  0x1d   : > { %s647_s29 = scalar_lea.vmem %s646_s28, 1024  ;;  %p648_p11 = scmp.lt.s32.totalorder %s801_s9, %s646_s28 }
  0x1e   : > { %p643_p0 = pnand %p641_p12, %p627_p13  ;;  %p649_p2 = scmp.lt.s32.totalorder %s647_s29, %s640_s24 }
  0x20   : > { %p644_p10 = pneg %p643_p0  ;;  %p650_p3 = por %p649_p2, %p648_p11 }
  0x22   : > { %p651_p4 = pnand %p650_p3, %p644_p10 }
  0x24   : > { %654 = shalt.err (!%p651_p4)
}
  0x25   : > { %557 = dma.hbm_to_vmem [thread:$0]  (!%p797_p9), %s793_s7, 512, %s801_s9, %s181_s11  }
  0x26   : > { %p916_p1 = scmp.lt.s32.totalorder %s705_s20, 3  ;;  %p917_p5 = scmp.ge.s32.totalorder %s705_s20, 1 }
  0x28   : > { %p214_p13 = pnand %p917_p5, %p916_p1 }
  0x29   : > { %s219_s30 = sand.u32 (!%p214_p13), 1, %s689_s16  }
  0x2a   : > { %217 = sbr.rel (%p214_p13) target bundleno = 657 (0x291), region = 32  ;;  %s543_s5 = sshll.u32 (!%p214_p13), %s219_s30, 5 }
  0x2b   : > { %s220_s6 = scalar_lea.sflag (!%p214_p13), [#allocation6], %s219_s30  ;;  %s223_s8 = scalar_lea.vmem (!%p214_p13), [#allocation5], %s543_s5 }
  0x31   : > { %680 = dma.done.wait (%p780_p7), %s220_s6, 512  }
  0x32   : > { %682 = vsyncadd (%p780_p7), %s220_s6, 4294966784  ;;  %p260_p10 = scmp.lt.s32.totalorder %s697_s18, 1  ;;  %v708_v0 = vmov 0   ;;  %v290_v3 = vlaneseq  ;;  %v284_v5 = vld [vmem:[%s223_s8] sm:$0xff]  ;;  %v285_v6 = vld [vmem:[%s223_s8 + $0x8] sm:$0xff]  ;;  %vm280_vm4 = vcmask 7168  }
  0x33   : > { %611 = vset.pattern.permute.xlu0 %v708_v0  ;;  %612 = vset.pattern.permute.xlu1 %v708_v0  ;;  %v286_v7 = vld [vmem:[%s223_s8 + $0x10] sm:$0xff]  ;;  %v287_v8 = vld [vmem:[%s223_s8 + $0x18] sm:$0xff]  ;;  %v305_v13 = vmul.f32 30.0, %v284_v5  ;;  %v306_v14 = vmul.f32 30.0, %v285_v6  ;;  %v709_v25 = vmov -inf   ;;  %v710_v26 = vmov 0.0  }
  0x34   : > { %s926_s18 = smov (!%p260_p10, %s697_s18), 1  ;;  %v291_v4 = vand.u32 127, %v290_v3  ;;  %v307_v15 = vmul.f32 30.0, %v286_v7  ;;  %v308_v16 = vmul.f32 30.0, %v287_v8  ;;  %281 = vst.msk [vmem:[#allocation2] sm:$0xff] %vm280_vm4, %v709_v25  ;;  %282 = vst.msk [vmem:[#allocation3] sm:$0xff] %vm280_vm4, %v710_v26 }
  0x35   : > { %s841_s7 = sshll.u32 %s926_s18, 3  ;;  %v711_v60 = vmov 512  }
  0x36   : > { %s263_s11 = scalar_lea.vmem %s909_s1, %s841_s7  ;;  %s267_s26 = scalar_lea.vmem %s910_s2, %s841_s7  ;;  %v292_v9 = vadd.s32 128, %v291_v4  ;;  %v293_v10 = vadd.s32 256, %v291_v4  ;;  %v294_v11 = vadd.s32 384, %v291_v4  ;;  %283 = vst.msk [vmem:[#allocation4] sm:$0xff] %vm280_vm4, %v711_v60 }
  0x37   : > { %v851_v1 = vld [vmem:[%s263_s11] sm:$0xff]  ;;  %s275_s15 = scalar_lea.vmem %s912_s4, %s841_s7  ;;  %s271_s24 = scalar_lea.vmem %s911_s3, %s841_s7 }
  0x38   : > { %299 = vperm.xlu0 %611, %v851_v1   ;;  %v854_v2 = vld [vmem:[%s267_s26] sm:$0xff] }
  0x3b   : > { %v860_v27 = vld [vmem:[#allocation2] sm:$0xff]  ;;  %v325_v63 = vld [vmem:[#allocation3] sm:$0xff] }
  0x3c   : > { %311 = vperm.xlu0 %611, %v854_v2  }
  0xb7   : > { %v300_v12 = vpop.permute.xlu0 %299 }
  0xb8   : > { %vm301_vm0 = vcmp.eq.s32.totalorder %v291_v4, %v300_v12  ;;  %vm302_vm1 = vcmp.eq.s32.totalorder %v292_v9, %v300_v12  ;;  %vm303_vm2 = vcmp.eq.s32.totalorder %v293_v10, %v300_v12  ;;  %vm304_vm3 = vcmp.eq.s32.totalorder %v294_v11, %v300_v12 }
  0xbb   : > { %v312_v17 = vpop.permute.xlu0 %311 }
  0xbc   : > { %v314_v18 = vsel %vm301_vm0, %v312_v17, %v305_v13  ;;  %v315_v19 = vsel %vm302_vm1, %v312_v17, %v306_v14  ;;  %v316_v20 = vsel %vm303_vm2, %v312_v17, %v307_v15  ;;  %v317_v21 = vsel %vm304_vm3, %v312_v17, %v308_v16 }
  0xbd   : > { %v318_v22 = vmax.f32 %v314_v18, %v315_v19  ;;  %v319_v23 = vmax.f32 %v316_v20, %v317_v21 }
  0xbf   : > { %v320_v24 = vmax.f32 %v318_v22, %v319_v23 }
  0xc1   : > { %321 = vmax.xlane.f32.xlu1 %v320_v24 }
 0x14e   : > { %v862_v28 = vpop.xlane.xlu1 %321 }
 0x14f   : > { %v324_v29 = vmax.f32 %v860_v27, %v862_v28  ;;  %vm355_vm5 = vcmp.eq.f32.partialorder %v314_v18, %v862_v28  ;;  %vm356_vm6 = vcmp.eq.f32.partialorder %v315_v19, %v862_v28  ;;  %vm357_vm7 = vcmp.eq.f32.partialorder %v316_v20, %v862_v28 }
 0x150   : > { %vm358_vm8 = vcmp.eq.f32.partialorder %v317_v21, %v862_v28  ;;  %v359_v30 = vsel %vm355_vm5, %v291_v4, 512  ;;  %v360_v31 = vsel %vm356_vm6, %v292_v9, 512  ;;  %v361_v32 = vsel %vm357_vm7, %v293_v10, 512  ;;  %v385_v9 = vld [vmem:[#allocation4] sm:$0xff] }
 0x151   : > { %332 = vperm.xlu1 %612, %v324_v29   ;;  %v326_v33 = vsub.f32 %v860_v27, %v324_v29  ;;  %388 = vst.msk [vmem:[#allocation2] sm:$0xff] %vm280_vm4, %v324_v29  ;;  %v362_v34 = vsel %vm358_vm8, %v294_v11, 512  ;;  %vm363_vm9 = vcmp.lt.s32.totalorder %v359_v30, %v360_v31  ;;  %vm384_vm13 = vcmp.gt.f32.partialorder %v862_v28, %v860_v27 }
 0x152   : > { %v364_v35 = vsel %vm363_vm9, %v359_v30, %v360_v31  ;;  %vm365_vm10 = vcmp.lt.s32.totalorder %v361_v32, %v362_v34 }
 0x153   : > { %v366_v36 = vsel %vm365_vm10, %v361_v32, %v362_v34  ;;  %v327_v61 = vmul.f32 1.442695, %v326_v33 }
 0x154   : > { %vm367_vm11 = vcmp.lt.s32.totalorder %v364_v35, %v366_v36 }
 0x155   : > { %v368_v37 = vsel %vm367_vm11, %v364_v35, %v366_v36 }
 0x156   : > { %v370_v38 = vshra.s32 %v368_v37, 16  ;;  %v369_v54 = vand.u32 65535, %v368_v37 }
 0x158   : > { %v372_v39 = vcvt.s32.f32 %v370_v38  ;;  %v371_v58 = vcvt.s32.f32 %v369_v54  ;;  %v392_v17 = vld [vmem:[#allocation2] sm:$0xff] }
 0x15a   : > { %373 = vmin.xlane.f32.xlu0 %v372_v39 }
 0x1d0   : > { %v333_v40 = vpop.permute.xlu1 %332 }
 0x1d1   : > { %v335_v41 = vsub.f32 %v314_v18, %v333_v40  ;;  %v336_v42 = vsub.f32 %v315_v19, %v333_v40  ;;  %v337_v43 = vsub.f32 %v316_v20, %v333_v40  ;;  %v338_v44 = vsub.f32 %v317_v21, %v333_v40 }
 0x1d3   : > { %v339_v45 = vmul.f32 1.442695, %v335_v41  ;;  %v341_v46 = vmul.f32 1.442695, %v336_v42  ;;  %v343_v47 = vmul.f32 1.442695, %v337_v43 }
 0x1d4   : > { %v345_v48 = vmul.f32 1.442695, %v338_v44 }
 0x1d5   : > { %613 = vpow2.f32 %v339_v45 }
 0x1d6   : > { %615 = vpow2.f32 %v341_v46 }
 0x1d7   : > { %617 = vpow2.f32 %v343_v47 }
 0x1d8   : > { %619 = vpow2.f32 %v345_v48 }
 0x1d9   : > { %621 = vpow2.f32 %v327_v61 }
 0x1df   : > { %v614_v49 = vpop.eup %613 }
 0x1e0   : > { %v616_v50 = vpop.eup %615 }
 0x1e1   : > { %v347_v51 = vadd.f32 %v616_v50, %v614_v49  ;;  %v618_v52 = vpop.eup %617 }
 0x1e2   : > { %v620_v55 = vpop.eup %619 }
 0x1e3   : > { %v348_v53 = vadd.f32 %v618_v52, %v347_v51  ;;  %v622_v62 = vpop.eup %621 }
 0x1e4   : > { %v329_v0 = vmul.f32 %v622_v62, %v325_v63 }
 0x1e5   : > { %v349_v56 = vadd.f32 %v620_v55, %v348_v53 }
 0x1e7   : > { %v374_v57 = vpop.xlane.xlu0 %373  ;;  %350 = vadd.xlane.f32.xlu1 %v349_v56 }
 0x1e8   : > { %vm375_vm12 = vcmp.eq.f32.partialorder %v372_v39, %v374_v57  ;;  %v380_v3 = vcvt.f32.s32 %v374_v57 }
 0x1e9   : > { %v376_v59 = vsel %vm375_vm12, %v371_v58, inf }
 0x1ea   : > { %377 = vmin.xlane.f32.xlu0 %v376_v59  ;;  %v381_v7 = vshll.u32 %v380_v3, 16 }
 0x274   : > { %v351_v4 = vpop.xlane.xlu1 %350 }
 0x275   : > { %v352_v5 = vadd.f32 %v351_v4, %v329_v0 }
 0x277   : > { %354 = vst.msk [vmem:[#allocation3] sm:$0xff] %vm280_vm4, %v352_v5  ;;  %v378_v6 = vpop.xlane.xlu0 %377 }
 0x278   : > { %v379_v8 = vcvt.f32.s32 %v378_v6 }
 0x27a   : > { %v382_v10 = vadd.s32 %v381_v7, %v379_v8 }
 0x27c   : > { %v386_v11 = vsel %vm384_vm13, %v382_v10, %v385_v9 }
 0x27d   : > { %387 = vst.msk [vmem:[#allocation4] sm:$0xff] %vm280_vm4, %v386_v11 }
 0x27e   : > { %v393_v12 = vld [vmem:[#allocation3] sm:$0xff] }
 0x27f   : > { %623 = vlog2.f32 %v393_v12 }
 0x284   : > { %v399_v13 = vld [vmem:[#allocation4] sm:$0xff] }
 0x285   : > { %vm400_vm14 = vcmp.eq.s32.totalorder %v399_v13, %v851_v1 }
 0x286   : > { %v548_v14 = vsel %vm400_vm14, 1.0, %v710_v26 }
 0x287   : > { %403 = vst.msk [vmem:[%s275_s15] sm:$0xff] %vm280_vm4, %v548_v14 }
 0x289   : > { %v624_v15 = vpop.eup %623 }
 0x28a   : > { %v395_v16 = vmul.f32 0.6931472, %v624_v15 }
 0x28c   : > { %v396_v18 = vadd.f32 %v395_v16, %v392_v17 }
 0x28e   : > { %v397_v19 = vsub.f32 %v396_v18, %v854_v2 }
 0x290   : > { %398 = vst.msk [vmem:[%s271_s24] sm:$0xff] %vm280_vm4, %v397_v19 }
 0x291 PF: > { %s18_s20 = sadd.s32 1, %s705_s20   ;;  %s918_s15 = smov %s689_s16 }
 0x292   : > { %p15_p7 = scmp.ge.s32.totalorder %s18_s20, 4   ;;  %s919_s16 = smov %s693_s17 }
 0x293   : > { %s920_s17 = smov %s786_s27  ;;  %s921_s18 = smov %s701_s19 }
 0x294   : > { %s922_s19 = smov %s924_s22  ;;  %17 = sbr.rel (!%p15_p7) target bundleno = 4 (0x4), region = 98 }
 0x29b   :  { %437 = vsyncpa [#allocation6], 1 }
 0x29c   :  { %439 = vsyncpa [#allocation6 + $0x1], 1 }

</bundles_post_ra>
